<compile_context>
chip_gen: v7x
topology: tpu7x:2x2x1
jax: 0.10.0
libtpu: 0.0.40
codegen_flags: <defaults>
</compile_context>

<pallas_src>
import functools

import jax
import jax.numpy as jnp
from jax.experimental import pallas as pl
from jax.experimental.pallas import tpu as pltpu

P_NORM = 2.0           # fixed at compile time (see note above)
EPS = 1e-6

_TILE_CAP = 1024                        # measured streaming sweet spot: 512-1024 rows
_TILE_VMEM_BUDGET = 12 * 1024 * 1024    # stays under v5e's 16 MiB scoped-VMEM default
                                        # (and well under v6e/v7x 32 MiB defaults)


def _pick_block_b(B, D):
    # 3 input streams x 2 pipeline buffers x block_b x D x 4 bytes (f32)
    per_row_bytes = 3 * 2 * D * 4
    tb = _TILE_VMEM_BUDGET // max(per_row_bytes, 1)
    tb = min(tb, _TILE_CAP)
    tb = max((tb // 8) * 8, 8)          # second-to-last block dim: multiple of 8
    if tb >= B:
        return B                        # single block covering the full batch
    return tb


def _triplet_loss_kernel(a_ref, p_ref, g_ref, o_ref, acc_ref, *,
                         margin, eps, total_b, block_b, size_average):
    i = pl.program_id(0)
    last = pl.num_programs(0) - 1

    @pl.when(i == 0)
    def _():
        acc_ref[0] = jnp.float32(0.0)

    a = a_ref[...].astype(jnp.float32)
    pos = p_ref[...].astype(jnp.float32)
    gen = g_ref[...].astype(jnp.float32)

    def pdist(x1, x2):
        # p = 2: square (VALU) + single sqrt (EUP) instead of pow() = exp/log.
        d = jnp.abs(x1 - x2) + eps
        return jnp.sqrt(jnp.sum(d * d, axis=1, keepdims=True))

    d_p = pdist(a, pos)   # (block_b, 1)
    d_n = pdist(a, gen)   # (block_b, 1)

    # matches torch.log(d + 1); clamp(min=0)
    hinge = jnp.maximum(jnp.log(d_p + 1.0) + margin - jnp.log(d_n + 1.0), 0.0)

    # Mask rows past the true batch size (tail tile when B % block_b != 0).
    row = jax.lax.broadcasted_iota(jnp.int32, hinge.shape, 0) + i * block_b
    hinge = jnp.where(row < total_b, hinge, 0.0)

    acc_ref[0] += jnp.sum(hinge)

    @pl.when(i == last)
    def _():
        denom = float(total_b) if size_average else 1.0
        o_ref[0, 0] = acc_ref[0] / jnp.float32(denom)


def triplet_loss(anchor, positive, generate, margin,
                 size_average=True, block_b=None):
    assert anchor.shape == positive.shape == generate.shape
    B, D = anchor.shape
    if block_b is None:
        block_b = _pick_block_b(B, D)
    grid = (pl.cdiv(B, block_b),)

    kernel = functools.partial(
        _triplet_loss_kernel,
        margin=float(margin), eps=EPS, total_b=B, block_b=block_b,
        size_average=bool(size_average),
    )

    in_spec = pl.BlockSpec((block_b, D), lambda i: (i, 0))
    out = pl.pallas_call(
        kernel,
        out_shape=jax.ShapeDtypeStruct((1, 1), jnp.float32),
        grid=grid,
        in_specs=[in_spec, in_spec, in_spec],
        # Scalar result lives in SMEM: no masked partial vector store.
        out_specs=pl.BlockSpec(memory_space=pltpu.MemorySpace.SMEM),
        scratch_shapes=[pltpu.SMEM((1,), jnp.float32)],
        compiler_params=pltpu.CompilerParams(
            dimension_semantics=("arbitrary",),   # running-sum over batch tiles
        ),
    )(anchor, positive, generate)
    # scalar loss, matching torch.mean's 0-d result
    return out[0, 0]


def _reference(anchor, positive, generate, margin, size_average=True):
    def pdist(x1, x2):
        d = jnp.abs(x1 - x2) + EPS
        return jnp.sqrt(jnp.sum(d * d, axis=1, keepdims=True))

    d_p = pdist(anchor, positive)
    d_n = pdist(anchor, generate)
    hinge = jnp.maximum(jnp.log(d_p + 1.0) + margin - jnp.log(d_n + 1.0), 0.0)
    return jnp.mean(hinge) if size_average else jnp.sum(hinge)


if __name__ == "__main__":
    key = jax.random.PRNGKey(0)
    k1, k2, k3 = jax.random.split(key, 3)

    B, D = 8, 32  # small shapes: batch of 8 embeddings, feature dim 32
    anchor = jax.random.normal(k1, (B, D), dtype=jnp.float32)
    positive = jax.random.normal(k2, (B, D), dtype=jnp.float32)
    generate = jax.random.normal(k3, (B, D), dtype=jnp.float32)
    margin = 0.5

    loss = triplet_loss(anchor, positive, generate, margin)
    jax.block_until_ready(loss)
    ref = _reference(anchor, positive, generate, margin)
    assert jnp.allclose(loss, ref, rtol=1e-5, atol=1e-5), (loss, ref)

    # Exercise the tiled path with a masked tail tile (B not a multiple of TB).
    B2 = 20
    k4, k5, k6 = jax.random.split(jax.random.PRNGKey(1), 3)
    a2 = jax.random.normal(k4, (B2, D), dtype=jnp.float32)
    p2 = jax.random.normal(k5, (B2, D), dtype=jnp.float32)
    g2 = jax.random.normal(k6, (B2, D), dtype=jnp.float32)
    loss2 = triplet_loss(a2, p2, g2, margin, block_b=8)
    jax.block_until_ready(loss2)
    ref2 = _reference(a2, p2, g2, margin)
    assert jnp.allclose(loss2, ref2, rtol=1e-5, atol=1e-5), (loss2, ref2)

    # size_average=False path (sum instead of mean)
    loss3 = triplet_loss(anchor, positive, generate, margin, size_average=False)
    jax.block_until_ready(loss3)
    ref3 = _reference(anchor, positive, generate, margin, size_average=False)
    assert jnp.allclose(loss3, ref3, rtol=1e-5, atol=1e-5), (loss3, ref3)

    print("KERNEL_OK")
</pallas_src>

<mosaic_0001>
module attributes {stable_mosaic.version = 11 : i64} {
  func.func @_triplet_loss_kernel(%arg0: i32, %arg1: memref<8x32xf32, #tpu.memory_space<vmem>>, %arg2: memref<8x32xf32, #tpu.memory_space<vmem>>, %arg3: memref<8x32xf32, #tpu.memory_space<vmem>>, %arg4: memref<1x1xf32, #tpu.memory_space<smem>>, %arg5: memref<1xf32, #tpu.memory_space<smem>>) attributes {dimension_semantics = [#tpu.dimension_semantics<arbitrary>], iteration_bounds = array<i64: 1>, scalar_prefetch = 0 : i64, scratch_operands = 1 : i64, tpu.core_type = #tpu.core_type<tc>, window_params = [{transform_indices = @transform_0, window_bounds = array<i64: 8, 32>}, {transform_indices = @transform_1, window_bounds = array<i64: 8, 32>}, {transform_indices = @transform_2, window_bounds = array<i64: 8, 32>}, {transform_indices = @transform_3, window_bounds = array<i64: 1, 1>}]} {
    %c0_i32 = arith.constant 0 : i32
    %0 = arith.cmpi eq, %arg0, %c0_i32 : i32
    %1 = arith.extui %0 : i1 to i32
    %c0_i32_0 = arith.constant 0 : i32
    %2 = arith.cmpi ne, %1, %c0_i32_0 : i32
    scf.if %2 {
      %cst_20 = arith.constant 0.000000e+00 : f32
      %c0_21 = arith.constant 0 : index
      %51 = memref.load %arg5[%c0_21] : memref<1xf32, #tpu.memory_space<smem>>
      memref.store %cst_20, %arg5[%c0_21] : memref<1xf32, #tpu.memory_space<smem>>
    } else {
    }
    %c0 = arith.constant 0 : index
    %c0_1 = arith.constant 0 : index
    %3 = vector.load %arg1[%c0, %c0_1] : memref<8x32xf32, #tpu.memory_space<vmem>>, vector<8x32xf32>
    %c0_2 = arith.constant 0 : index
    %c0_3 = arith.constant 0 : index
    %4 = vector.load %arg2[%c0_2, %c0_3] : memref<8x32xf32, #tpu.memory_space<vmem>>, vector<8x32xf32>
    %c0_4 = arith.constant 0 : index
    %c0_5 = arith.constant 0 : index
    %5 = vector.load %arg3[%c0_4, %c0_5] : memref<8x32xf32, #tpu.memory_space<vmem>>, vector<8x32xf32>
    %6 = arith.subf %3, %4 : vector<8x32xf32>
    %7 = math.absf %6 : vector<8x32xf32>
    %cst = arith.constant 9.99999997E-7 : f32
    %8 = vector.broadcast %cst : f32 to vector<8x32xf32>
    %9 = arith.addf %7, %8 : vector<8x32xf32>
    %10 = arith.mulf %9, %9 : vector<8x32xf32>
    %cst_6 = arith.constant dense<0.000000e+00> : vector<8xf32>
    %11 = vector.multi_reduction <add>, %10, %cst_6 [1] : vector<8x32xf32> to vector<8xf32>
    %12 = vector.shape_cast %11 : vector<8xf32> to vector<8x1xf32>
    %13 = math.sqrt %12 : vector<8x1xf32>
    %14 = arith.subf %3, %5 : vector<8x32xf32>
    %15 = math.absf %14 : vector<8x32xf32>
    %cst_7 = arith.constant 9.99999997E-7 : f32
    %16 = vector.broadcast %cst_7 : f32 to vector<8x32xf32>
    %17 = arith.addf %15, %16 : vector<8x32xf32>
    %18 = arith.mulf %17, %17 : vector<8x32xf32>
    %cst_8 = arith.constant dense<0.000000e+00> : vector<8xf32>
    %19 = vector.multi_reduction <add>, %18, %cst_8 [1] : vector<8x32xf32> to vector<8xf32>
    %20 = vector.shape_cast %19 : vector<8xf32> to vector<8x1xf32>
    %21 = math.sqrt %20 : vector<8x1xf32>
    %cst_9 = arith.constant 1.000000e+00 : f32
    %22 = vector.broadcast %cst_9 : f32 to vector<8x1xf32>
    %23 = arith.addf %13, %22 : vector<8x1xf32>
    %24 = math.log %23 : vector<8x1xf32>
    %cst_10 = arith.constant 5.000000e-01 : f32
    %25 = vector.broadcast %cst_10 : f32 to vector<8x1xf32>
    %26 = arith.addf %24, %25 : vector<8x1xf32>
    %cst_11 = arith.constant 1.000000e+00 : f32
    %27 = vector.broadcast %cst_11 : f32 to vector<8x1xf32>
    %28 = arith.addf %21, %27 : vector<8x1xf32>
    %29 = math.log %28 : vector<8x1xf32>
    %30 = arith.subf %26, %29 : vector<8x1xf32>
    %cst_12 = arith.constant 0.000000e+00 : f32
    %31 = vector.broadcast %cst_12 : f32 to vector<8x1xf32>
    %32 = arith.maximumf %30, %31 : vector<8x1xf32>
    %33 = tpu.iota {dimensions = array<i32: 0>} : vector<8x1xi32>
    %c8_i32 = arith.constant 8 : i32
    %34 = arith.muli %arg0, %c8_i32 : i32
    %35 = vector.broadcast %34 : i32 to vector<8x1xi32>
    %36 = arith.addi %33, %35 : vector<8x1xi32>
    %c8_i32_13 = arith.constant 8 : i32
    %37 = vector.broadcast %c8_i32_13 : i32 to vector<8x1xi32>
    %38 = arith.cmpi slt, %36, %37 : vector<8x1xi32>
    %cst_14 = arith.constant 0.000000e+00 : f32
    %39 = vector.broadcast %cst_14 : f32 to vector<8x1xf32>
    %40 = arith.select %38, %32, %39 : vector<8x1xi1>, vector<8x1xf32>
    %c0_15 = arith.constant 0 : index
    %41 = memref.load %arg5[%c0_15] : memref<1xf32, #tpu.memory_space<smem>>
    %42 = vector.shape_cast %40 : vector<8x1xf32> to vector<1x8x1xf32>
    %cst_16 = arith.constant dense<0.000000e+00> : vector<1xf32>
    %43 = vector.multi_reduction <add>, %42, %cst_16 [1, 2] : vector<1x8x1xf32> to vector<1xf32>
    %44 = vector.shape_cast %43 : vector<1xf32> to vector<1x1x1xf32>
    %45 = vector.extract %44[0, 0, 0] : f32 from vector<1x1x1xf32>
    %46 = arith.addf %41, %45 : f32
    %c0_17 = arith.constant 0 : index
    %47 = memref.load %arg5[%c0_17] : memref<1xf32, #tpu.memory_space<smem>>
    memref.store %46, %arg5[%c0_17] : memref<1xf32, #tpu.memory_space<smem>>
    %c0_i32_18 = arith.constant 0 : i32
    %48 = arith.cmpi eq, %arg0, %c0_i32_18 : i32
    %49 = arith.extui %48 : i1 to i32
    %c0_i32_19 = arith.constant 0 : i32
    %50 = arith.cmpi ne, %49, %c0_i32_19 : i32
    scf.if %50 {
      %c0_20 = arith.constant 0 : index
      %51 = memref.load %arg5[%c0_20] : memref<1xf32, #tpu.memory_space<smem>>
      %cst_21 = arith.constant 8.000000e+00 : f32
      %52 = arith.divf %51, %cst_21 : f32
      %c0_22 = arith.constant 0 : index
      %c0_23 = arith.constant 0 : index
      %53 = memref.load %arg4[%c0_22, %c0_23] : memref<1x1xf32, #tpu.memory_space<smem>>
      memref.store %52, %arg4[%c0_22, %c0_23] : memref<1x1xf32, #tpu.memory_space<smem>>
    } else {
    }
    return
  }
  func.func @transform_0(%arg0: i32) -> (i32, i32) {
    %c0_i32 = arith.constant 0 : i32
    %c0_i32_0 = arith.constant 0 : i32
    return %arg0, %c0_i32 : i32, i32
  }
  func.func @transform_1(%arg0: i32) -> (i32, i32) {
    %c0_i32 = arith.constant 0 : i32
    %c0_i32_0 = arith.constant 0 : i32
    return %arg0, %c0_i32 : i32, i32
  }
  func.func @transform_2(%arg0: i32) -> (i32, i32) {
    %c0_i32 = arith.constant 0 : i32
    %c0_i32_0 = arith.constant 0 : i32
    return %arg0, %c0_i32 : i32, i32
  }
  func.func @transform_3(%arg0: i32) -> (i32, i32) {
    %c0_i32 = arith.constant 0 : i32
    %c0_i32_0 = arith.constant 0 : i32
    %c0_i32_1 = arith.constant 0 : i32
    return %c0_i32, %c0_i32_0 : i32, i32
  }
}

</mosaic_0001>

<bundles_post_ra>
// kernel: tpu_custom_call.1
= control target key start
LH: loop header
LB: loop body
LE: loop exit
PB: predicated region body
PF: predicated region fallthrough
CT: control target
= control target key end

     0   :  { %8 = vsyncpa [#allocation4], 0  ;;  %s311_s0 = inlined_call_operand.hbm [shape: f32[8,32], index: 0, kind: input, shape index: {}]   ;;  %s312_s1 = inlined_call_operand.hbm [shape: f32[8,32], index: 1, kind: input, shape index: {}]   ;;  %s313_s2 = inlined_call_operand.hbm [shape: f32[8,32], index: 2, kind: input, shape index: {}]   ;;  %s314_s3 = inlined_call_operand.hbm [shape: f32[1,1], index: 3, kind: output, shape index: {}]  }
   0x1   :  { %9 = vsyncpa [#allocation7], 0 }
   0x2   :  { %10 = vsyncpa [#allocation5], 0  ;;  %s239_s12 = smov [#allocation6]   ;;  %s240_s14 = smov [#allocation3]  }
   0x3   :  { %s27_s13 = sshll.u32 %s239_s12, 4  ;;  %s17_s15 = sshll.u32 %s240_s14, 4  ;;  %s28_s13 = int_to_ptr.vmem [resolvable:$true] %s27_s13  ;;  %s18_s15 = int_to_ptr.vmem [resolvable:$true] %s17_s15 }
   0x4   :  { %s157_s18 = scalar_lea.hbm %s312_s1, 128 }
   0x5   :  { %p158_p0 = scmp.ne.s32.totalorder %s312_s1, %s157_s18  ;;  %p161_p1 = scmp.lt.u32.totalorder %s157_s18, %s312_s1 }
   0x7   :  { %p163_p2 = pnand %p161_p1, %p158_p0 }
   0x9   :  { %166 = shalt.err (!%p163_p2)
}
   0xa   :  { %s167_s23 = scalar_lea.vmem %s28_s13, 128  ;;  %p172_p4 = scmp.lt.s32.totalorder %s28_s13, %s28_s13 }
   0xb   :  { %p168_p3 = scmp.ne.s32.totalorder %s28_s13, %s167_s23  ;;  %p173_p5 = scmp.lt.s32.totalorder %s167_s23, %s167_s23 }
   0xd   :  { %p174_p6 = por %p173_p5, %p172_p4 }
   0xf   :  { %p175_p7 = pnand %p174_p6, %p168_p3 }
  0x11   :  { %178 = shalt.err (!%p175_p7)
}
  0x12   :  { %30 = dma.hbm_to_vmem [thread:$0]  %s312_s1, 128, %s28_s13, [#allocation7]  }
  0x13   :  { %s179_s28 = scalar_lea.hbm %s311_s0, 128 }
  0x14   :  { %p180_p8 = scmp.ne.s32.totalorder %s311_s0, %s179_s28  ;;  %p183_p9 = scmp.lt.u32.totalorder %s179_s28, %s311_s0 }
  0x16   :  { %p185_p10 = pnand %p183_p9, %p180_p8 }
  0x18   :  { %188 = shalt.err (!%p185_p10)
}
  0x19   :  { %s189_s6 = scalar_lea.vmem %s18_s15, 128  ;;  %p194_p12 = scmp.lt.s32.totalorder %s18_s15, %s18_s15 }
  0x1a   :  { %p190_p11 = scmp.ne.s32.totalorder %s18_s15, %s189_s6  ;;  %p195_p13 = scmp.lt.s32.totalorder %s189_s6, %s189_s6 }
  0x1c   :  { %p196_p0 = por %p195_p13, %p194_p12 }
  0x1e   :  { %p197_p1 = pnand %p196_p0, %p190_p11 }
  0x20   :  { %200 = shalt.err (!%p197_p1)
}
  0x21   :  { %20 = dma.hbm_to_vmem [thread:$0]  %s311_s0, 128, %s18_s15, [#allocation4]  }
  0x22   :  { %s241_s8 = smov [#allocation8]   ;;  %s201_s12 = scalar_lea.hbm %s313_s2, 128 }
  0x23   :  { %s37_s9 = sshll.u32 %s241_s8, 4  ;;  %p202_p2 = scmp.ne.s32.totalorder %s313_s2, %s201_s12  ;;  %s38_s9 = int_to_ptr.vmem [resolvable:$true] %s37_s9 }
  0x24   :  { %p205_p3 = scmp.lt.u32.totalorder %s201_s12, %s313_s2 }
  0x26   :  { %p207_p4 = pnand %p205_p3, %p202_p2 }
  0x28   :  { %210 = shalt.err (!%p207_p4)
}
  0x29   :  { %s211_s18 = scalar_lea.vmem %s38_s9, 128  ;;  %p216_p6 = scmp.lt.s32.totalorder %s38_s9, %s38_s9 }
  0x2a   :  { %p212_p5 = scmp.ne.s32.totalorder %s38_s9, %s211_s18  ;;  %p217_p7 = scmp.lt.s32.totalorder %s211_s18, %s211_s18 }
  0x2c   :  { %p218_p8 = por %p217_p7, %p216_p6 }
  0x2e   :  { %p219_p9 = pnand %p218_p8, %p212_p5 }
  0x30   :  { %222 = shalt.err (!%p219_p9)
}
  0x31   :  { %40 = dma.hbm_to_vmem [thread:$0]  %s313_s2, 128, %s38_s9, [#allocation7]  }
  0x32   :  { %233 = dma.done.wait [#allocation4], 128  }
  0x33   :  { %234 = vsyncadd [#allocation4], 4294967168 }
  0x34   :  { %235 = dma.done.wait [#allocation7], 256  }
  0x35   :  { %236 = vsyncadd [#allocation7], 4294967040  ;;  %v56_v0 = vld [vmem:[#allocation3] sm:$0xff]  ;;  %v57_v1 = vld [vmem:[#allocation6] sm:$0xff]  ;;  %vm63_vm0 = vcmask 261120   ;;  %vm105_vm5 = vcmask 7168  }
  0x36   :  { %v58_v2 = vld [vmem:[#allocation8] sm:$0xff]  ;;  %v59_v3 = vsub.f32 %v56_v0, %v57_v1  ;;  %s223_s22 = scalar_lea.hbm %s314_s3, 16 }
  0x37   :  { %v74_v4 = vsub.f32 %v56_v0, %v58_v2  ;;  %p224_p10 = scmp.ne.s32.totalorder %s314_s3, %s223_s22  ;;  %p227_p11 = scmp.lt.u32.totalorder %s223_s22, %s314_s3 }
  0x38   :  { %v60_v5 = vand.u32 2147483647, %v59_v3 }
  0x39   :  { %v75_v6 = vand.u32 2147483647, %v74_v4  ;;  %p229_p12 = pnand %p227_p11, %p224_p10 }
  0x3a   :  { %v61_v7 = vadd.f32 1e-06, %v60_v5 }
  0x3b   :  { %v76_v8 = vadd.f32 1e-06, %v75_v6 }
  0x3c   :  { %v62_v9 = vmul.f32 %v61_v7, %v61_v7 }
  0x3d   :  { %v77_v10 = vmul.f32 %v76_v8, %v76_v8 }
  0x3e   :  { %v64_v11 = vsel %vm63_vm0, %v62_v9, 0.0 }
  0x3f   :  { %65 = vadd.xlane.f32.xlu0 %v64_v11  ;;  %v78_v12 = vsel %vm63_vm0, %v77_v10, 0.0 }
  0x43   :  { %79 = vadd.xlane.f32.xlu0 %v78_v12 }
  0xcc   :  { %v66_v13 = vpop.xlane.xlu0 %65 }
  0xcd   :  { %149 = vrsqrt.f32 %v66_v13  ;;  %vm69_vm1 = vcmp.eq.f32.partialorder %v66_v13, inf  ;;  %v72_v17 = vand.u32 2147483648, %v66_v13  ;;  %vm71_vm2 = vcmp.eq.f32.partialorder %v66_v13, 0.0 }
  0xd0   :  { %v80_v14 = vpop.xlane.xlu0 %79 }
  0xd1   :  { %151 = vrsqrt.f32 %v80_v14  ;;  %vm83_vm3 = vcmp.eq.f32.partialorder %v80_v14, inf  ;;  %v86_v23 = vand.u32 2147483648, %v80_v14  ;;  %vm85_vm4 = vcmp.eq.f32.partialorder %v80_v14, 0.0 }
  0xd7   :  { %v150_v15 = vpop.eup %149 }
  0xd8   :  { %v68_v16 = vmul.f32 %v150_v15, %v66_v13 }
  0xda   :  { %v70_v18 = vsel %vm69_vm1, %v66_v13, %v68_v16 }
  0xdb   :  { %v152_v19 = vpop.eup %151  ;;  %v73_v20 = vsel %vm71_vm2, %v72_v17, %v70_v18 }
  0xdc   :  { %v82_v21 = vmul.f32 %v152_v19, %v80_v14  ;;  %v88_v22 = vadd.f32 1.0, %v73_v20 }
  0xde   :  { %v84_v24 = vsel %vm83_vm3, %v80_v14, %v82_v21  ;;  %153 = vlog2.f32 %v88_v22 }
  0xdf   :  { %v87_v25 = vsel %vm85_vm4, %v86_v23, %v84_v24 }
  0xe0   :  { %v92_v26 = vadd.f32 1.0, %v87_v25 }
  0xe2   :  { %155 = vlog2.f32 %v92_v26 }
  0xe8   :  { %v154_v27 = vpop.eup %153 }
  0xe9   :  { %v90_v28 = vmul.f32 0.6931472, %v154_v27 }
  0xeb   :  { %v91_v30 = vadd.f32 0.5, %v90_v28 }
  0xec   :  { %v156_v29 = vpop.eup %155 }
  0xed   :  { %v94_v31 = vmul.f32 0.6931472, %v156_v29 }
  0xef   :  { %v95_v32 = vsub.f32 %v91_v30, %v94_v31 }
  0xf1   :  { %v96_v33 = vmax.f32 %v95_v32, 0.0 }
  0xf3   :  { %v106_v34 = vsel %vm105_vm5, %v96_v33, 0.0 }
  0xf4   :  { %107 = vadd.xlane.f32.xlu1 %v106_v34 }
 0x181   :  { %v108_v35 = vpop.xlane.xlu1 %107 }
 0x182   :  { %v109_v36 = vrot.slane %v108_v35, 4 }
 0x184   :  { %v110_v37 = vadd.f32 %v109_v36, %v108_v35 }
 0x186   :  { %v111_v38 = vrot.slane %v110_v37, 2 }
 0x188   :  { %v112_v39 = vadd.f32 %v111_v38, %v110_v37 }
 0x18a   :  { %v113_v40 = vrot.slane %v112_v39, 1 }
 0x18c   :  { %v114_v41 = vadd.f32 %v113_v40, %v112_v39 }
 0x18e   :  { %143 = vpush %v114_v41 }
 0x1bf   :  { %s144_s2 = spop %143 }
 0x1c0   :  { %s125_s19 = smul.f32 0.125, %s144_s2 }
 0x1c2   :  { %127 = sst [smem:[#allocation9]] %s125_s19 }
 0x1c3   :  { %232 = shalt.err (!%p229_p12)
}
 0x1c4   :  { %s242_s27 = smov [#allocation9]  }
 0x1c5   :  { %135 = dma.smem_to_hbm %s242_s27, 16, %s314_s3, [#allocation5]  }
 0x1c6   :  { %237 = dma.done.wait [#allocation5], 16  }
 0x1c7   :  { %238 = vsyncadd [#allocation5], 4294967280 }
 0x1c8   :  { %139 = sfence }
 0x1c9   :  { %140 = vsyncpa [#allocation4], 1 }
 0x1ca   :  { %141 = vsyncpa [#allocation7], 1 }
 0x1cb   :  { %142 = vsyncpa [#allocation5], 1 }

</bundles_post_ra>
